<compile_context>
chip_gen: v5e
topology: v5e:2x2
jax: 0.10.0
libtpu: 0.0.40
codegen_flags: <defaults>
</compile_context>

<pallas_src>
import jax
import jax.numpy as jnp
import numpy as np
from jax.experimental import pallas as pl
from jax.experimental.pallas import tpu as pltpu


def _round_up(n, m):
    return ((n + m - 1) // m) * m


def _cdiv(a, b):
    return -(-a // b)


def _gfp_kernel(x_ref, w_ref, out_ref):
    # x_ref: (tb, 1) f32, w_ref: (1, half) f32 (2*pi already folded in),
    # out_ref: (tb, 2*half) out_dtype.
    half = w_ref.shape[1]
    proj = x_ref[...] * w_ref[...]                       # (tb, half) broadcast outer product (VPU)
    # Two lane-aligned half-width stores (half % 128 == 0 -> unmasked full-width vst).
    out_ref[:, :half] = jnp.sin(proj).astype(out_ref.dtype)
    out_ref[:, half:] = jnp.cos(proj).astype(out_ref.dtype)


def gaussian_fourier_projection(x, w_scaled, *, block_b=4096, out_dtype=jnp.float32):
    """x: (B,) f32, w_scaled: (half,) f32 with the 2*pi factor already folded in.

    Returns (B, 2*half) in out_dtype: concat([sin(x*w), cos(x*w)], axis=-1).
    """
    B = x.shape[0]
    half = w_scaled.shape[0]
    # Both halves of the output must be lane-dense / 128-aligned (unmasked vst).
    assert half % 128 == 0, f"half(={half}) must be a multiple of 128"

    # Batch tile: multiple of 8 sublanes, capped at block_b.
    tb = min(_round_up(block_b, 8), _round_up(B, 8))
    nb = _cdiv(B, tb)
    # Prefer an even number of grid steps (when >1) so the "parallel" axis splits
    # evenly across v7x's 2 TensorCores.
    if nb > 1 and nb % 2 == 1:
        tb = _round_up(_cdiv(B, nb + 1), 8)
        nb = _cdiv(B, tb)

    x2d = x.reshape(B, 1).astype(jnp.float32)
    w2d = w_scaled.reshape(1, half).astype(jnp.float32)

    out_itemsize = jnp.dtype(out_dtype).itemsize
    cost = pl.CostEstimate(
        flops=B * half,                                   # the broadcast multiply
        transcendentals=2 * B * half,                     # sin + cos
        bytes_accessed=B * 4 + half * 4 + B * 2 * half * out_itemsize,
    )

    out = pl.pallas_call(
        _gfp_kernel,
        out_shape=jax.ShapeDtypeStruct((B, 2 * half), out_dtype),
        grid=(nb,),
        in_specs=[
            pl.BlockSpec((tb, 1), lambda i: (i, 0)),      # x tile, walks over batch
            pl.BlockSpec((1, half), lambda i: (0, 0)),    # W resident across the grid
        ],
        out_specs=pl.BlockSpec((tb, 2 * half), lambda i: (i, 0)),
        compiler_params=pltpu.CompilerParams(
            dimension_semantics=("parallel",),            # independent rows -> megacore on v7x
        ),
        cost_estimate=cost,
    )(x2d, w2d)
    return out
    # TODO(synk): for tiny B (<~1k) the call is pallas_call-launch-overhead bound; a
    # plain-XLA sin/cos path is at least as fast if the caller wants to opt in.


if __name__ == "__main__":
    # Deterministic parameter init (matches nn.Parameter(torch.randn(half) * scale)).
    embed_dim = 256
    scale = 30.0
    half = embed_dim // 2

    key = jax.random.PRNGKey(0)
    k_w, k_x = jax.random.split(key)
    W = jax.random.normal(k_w, (half,), dtype=jnp.float32) * scale
    # Fold the constant 2*pi into the frozen parameter once, at init time.
    W_scaled = W * (2.0 * np.pi)

    # Small example input: a batch of 8 scalar "timesteps".
    B = 8
    x = jax.random.uniform(k_x, (B,), dtype=jnp.float32)

    out = gaussian_fourier_projection(x, W_scaled)
    out = jax.block_until_ready(out)
    assert out.shape == (B, embed_dim), out.shape

    # Tight check: reference built from the SAME folded parameter the kernel uses
    # (identical f32 arguments -> only sin/cos implementation ulps remain).
    proj = x[:, None] * W_scaled[None, :]
    ref_folded = jnp.concatenate([jnp.sin(proj), jnp.cos(proj)], axis=-1)
    np.testing.assert_allclose(np.asarray(out), np.asarray(ref_folded),
                               atol=2e-4, rtol=2e-4)

    # Semantics check vs the literal PyTorch formula (x * W * 2 * pi).  The
    # argument differs from the folded form by ~1 ulp; sin/cos of |arg| up to a
    # few hundred amplify that to ~1e-4, hence the looser tolerance here.
    proj2 = x[:, None] * W[None, :] * 2.0 * np.pi
    ref_torch = jnp.concatenate([jnp.sin(proj2), jnp.cos(proj2)], axis=-1)
    np.testing.assert_allclose(np.asarray(out), np.asarray(ref_torch),
                               atol=2e-3, rtol=2e-2)

    print("KERNEL_OK")
</pallas_src>

<mosaic_0001>
module attributes {stable_mosaic.version = 11 : i64} {
  func.func @_gfp_kernel(%arg0: i32, %arg1: memref<8x1xf32, #tpu.memory_space<vmem>>, %arg2: memref<1x128xf32, #tpu.memory_space<vmem>>, %arg3: memref<8x256xf32, #tpu.memory_space<vmem>>) attributes {dimension_semantics = [#tpu.dimension_semantics<parallel>], iteration_bounds = array<i64: 1>, scalar_prefetch = 0 : i64, scratch_operands = 0 : i64, tpu.core_type = #tpu.core_type<tc>, window_params = [{transform_indices = @transform_0, window_bounds = array<i64: 8, 1>}, {pipeline_mode = #tpu.pipeline_mode<synchronous>, transform_indices = @transform_1, window_bounds = array<i64: 1, 128>}, {transform_indices = @transform_2, window_bounds = array<i64: 8, 256>}]} {
    %c0 = arith.constant 0 : index
    %c0_0 = arith.constant 0 : index
    %0 = vector.load %arg1[%c0, %c0_0] : memref<8x1xf32, #tpu.memory_space<vmem>>, vector<8x1xf32>
    %c0_1 = arith.constant 0 : index
    %c0_2 = arith.constant 0 : index
    %1 = vector.load %arg2[%c0_1, %c0_2] : memref<1x128xf32, #tpu.memory_space<vmem>>, vector<1x128xf32>
    %2 = vector.broadcast %0 : vector<8x1xf32> to vector<8x128xf32>
    %3 = vector.broadcast %1 : vector<1x128xf32> to vector<8x128xf32>
    %4 = arith.mulf %2, %3 : vector<8x128xf32>
    %5 = math.sin %4 : vector<8x128xf32>
    %c0_3 = arith.constant 0 : index
    %c0_4 = arith.constant 0 : index
    %6 = vector.load %arg3[%c0_3, %c0_4] : memref<8x256xf32, #tpu.memory_space<vmem>>, vector<8x128xf32>
    tpu.vector_store %arg3[%c0_3, %c0_4], %5 {strides = array<i32>} : memref<8x256xf32, #tpu.memory_space<vmem>>, vector<8x128xf32>,
    %7 = math.cos %4 : vector<8x128xf32>
    %c0_5 = arith.constant 0 : index
    %c128 = arith.constant 128 : index
    %8 = vector.load %arg3[%c0_5, %c128] : memref<8x256xf32, #tpu.memory_space<vmem>>, vector<8x128xf32>
    tpu.vector_store %arg3[%c0_5, %c128], %7 {strides = array<i32>} : memref<8x256xf32, #tpu.memory_space<vmem>>, vector<8x128xf32>,
    return
  }
  func.func @transform_0(%arg0: i32) -> (i32, i32) {
    %c0_i32 = arith.constant 0 : i32
    %c0_i32_0 = arith.constant 0 : i32
    return %arg0, %c0_i32 : i32, i32
  }
  func.func @transform_1(%arg0: i32) -> (i32, i32) {
    %c0_i32 = arith.constant 0 : i32
    %c0_i32_0 = arith.constant 0 : i32
    %c0_i32_1 = arith.constant 0 : i32
    return %c0_i32, %c0_i32_0 : i32, i32
  }
  func.func @transform_2(%arg0: i32) -> (i32, i32) {
    %c0_i32 = arith.constant 0 : i32
    %c0_i32_0 = arith.constant 0 : i32
    return %arg0, %c0_i32 : i32, i32
  }
}

</mosaic_0001>

<bundles_post_ra>
// kernel: tpu_custom_call.1
= control target key start
LH: loop header
LB: loop body
LE: loop exit
PB: predicated region body
PF: predicated region fallthrough
CT: control target
= control target key end

     0   :  { %v392_v1 = vmov 0   ;;  %s485_s0 = inlined_call_operand.vmem [shape: f32[8,1], index: 0, kind: input, shape index: {}]   ;;  %s486_s1 = inlined_call_operand.vmem [shape: f32[1,128], index: 1, kind: input, shape index: {}]   ;;  %s487_s2 = inlined_call_operand.hbm [shape: f32[8,256], index: 2, kind: output, shape index: {}]  }
   0x1   :  { %v12_v0 = vld [vmem:[%s485_s0] sm:$0xff]  ;;  %364 = vset.pattern.permute.xlu0 %v392_v1 }
   0x2   :  { %16 = vperm.xlu0 %364, %v12_v0  }
   0x3   :  { %7 = vsyncpa [#allocation3], 0  ;;  %v365_v2 = vld [vmem:[%s486_s1] ss:$0 sm:$0xff]  ;;  %v393_v16 = vmov 683565275  }
   0x4   :  { %v394_v18 = vmov 2475754826   ;;  %v395_v21 = vmov 2131351028   ;;  %v396_v24 = vmov 2102212464  }
   0x5   :  { %v397_v27 = vmov 920167782   ;;  %v398_v30 = vmov 1326507024   ;;  %s399_s0 = smov [#allocation2]   ;;  %s341_s15 = sshll.u32 %s487_s2, 4  ;;  %s342_s15 = int_to_ptr.hbm [resolvable:$true] %s341_s15 }
   0x6   :  { %s339_s1 = sshll.u32 %s399_s0, 4  ;;  %s340_s1 = int_to_ptr.vmem [resolvable:$true] %s339_s1 }
  0x74   :  { %v17_v3 = vpop.permute.xlu0 %16 }
  0x75   :  { %v422_v4 = vmul.f32 %v365_v2, %v17_v3 }
  0x77   :  { %v26_v5 = vand.u32 2139095040, %v422_v4  ;;  %v23_v8 = vand.u32 2147483647, %v422_v4  ;;  %vm25_vm12 = vcmp.lt.s32.totalorder %v422_v4, 0 }
  0x79   :  { %v27_v6 = vshrl.u32 %v26_v5, 23  ;;  %v30_v10 = vand.u32 8388607, %v23_v8  ;;  %vm24_vm13 = vcmp.le.f32.partialorder %v23_v8, 0.7853982 }
  0x7b   :  { %v350_v7 = vadd.s32 4294967169, %v27_v6  ;;  %v31_v14 = vor.u32 8388608, %v30_v10 }
  0x7d   :  { %v33_v9 = vadd.s32 1, %v350_v7  ;;  %v439_v37 = vshll.u32 %v31_v14, 8 }
  0x7f   :  { %vm34_vm0 = vcmp.gt.s32.totalorder %v33_v9, 0  ;;  %v72_v46 = vand.u32 65535, %v439_v37  ;;  %v73_v47 = vshrl.u32 %v439_v37, 16 }
  0x80   :  { %v35_v11 = vsel %vm34_vm0, %v33_v9, 0 }
  0x81   :  { %v37_v12 = vand.u32 31, %v35_v11  ;;  %v430_v15 = vshrl.u32 %v35_v11, 5 }
  0x83   :  { %v428_v13 = vsub.s32 32, %v37_v12  ;;  %v40_v17 = vshll.u32 %v393_v16, %v37_v12  ;;  %v43_v19 = vshll.u32 %v394_v18, %v37_v12  ;;  %v46_v23 = vshll.u32 %v395_v21, %v37_v12 }
  0x84   :  { %v49_v26 = vshll.u32 %v396_v24, %v37_v12  ;;  %v52_v29 = vshll.u32 %v397_v27, %v37_v12  ;;  %vm55_vm1 = vcmp.lt.s32.totalorder %v430_v15, 1  ;;  %vm58_vm2 = vcmp.lt.s32.totalorder %v430_v15, 4 }
  0x85   :  { %v41_v20 = vshrl.u32 %v394_v18, %v428_v13  ;;  %v44_v22 = vshrl.u32 %v395_v21, %v428_v13  ;;  %v47_v25 = vshrl.u32 %v396_v24, %v428_v13  ;;  %v50_v28 = vshrl.u32 %v397_v27, %v428_v13 }
  0x86   :  { %v53_v31 = vshrl.u32 %v398_v30, %v428_v13  ;;  %vm57_vm3 = vcmp.lt.s32.totalorder %v430_v15, 3  ;;  %vm56_vm4 = vcmp.lt.s32.totalorder %v430_v15, 2  ;;  %v39_v11 = vshrl.u32 %v393_v16, %v428_v13 }
  0x87   :  { %v42_v32 = vor.u32 %v41_v20, %v40_v17  ;;  %v45_v33 = vor.u32 %v44_v22, %v43_v19  ;;  %v48_v34 = vor.u32 %v47_v25, %v46_v23  ;;  %v51_v35 = vor.u32 %v50_v28, %v49_v26 }
  0x88   :  { %v54_v36 = vor.u32 %v53_v31, %v52_v29 }
  0x89   :  { %v63_v38 = vsel %vm55_vm1, %v42_v32, %v45_v33  ;;  %v67_v39 = vsel %vm55_vm1, %v45_v33, %v48_v34  ;;  %v64_v40 = vsel %vm58_vm2, %v51_v35, 920167782  ;;  %v60_v7 = vsel %vm58_vm2, %v48_v34, 2102212464 }
  0x8a   :  { %v68_v41 = vsel %vm58_vm2, %v54_v36, 1326507024  ;;  %v65_v42 = vsel %vm57_vm3, %v48_v34, %v64_v40  ;;  %v59_v20 = vsel %vm55_vm1, %v39_v11, %v42_v32  ;;  %v61_v21 = vsel %vm57_vm3, %v45_v33, %v60_v7 }
  0x8b   :  { %v69_v43 = vsel %vm57_vm3, %v51_v35, %v68_v41  ;;  %v66_v44 = vsel %vm56_vm4, %v63_v38, %v65_v42  ;;  %v62_v13 = vsel %vm56_vm4, %v59_v20, %v61_v21 }
  0x8c   :  { %v70_v45 = vsel %vm56_vm4, %v67_v39, %v69_v43  ;;  %v96_v50 = vand.u32 65535, %v66_v44  ;;  %v97_v51 = vshrl.u32 %v66_v44, 16  ;;  %v116_v28 = vmul.u32 %v439_v37, %v62_v13 }
  0x8d   :  { %v74_v48 = vand.u32 65535, %v70_v45  ;;  %v75_v49 = vshrl.u32 %v70_v45, 16  ;;  %vm166_vm4 = vweird.f32 %v422_v4 }
  0x8e   :  { %v99_v54 = vmul.u32 %v97_v51, %v72_v46  ;;  %v100_v55 = vmul.u32 %v96_v50, %v73_v47  ;;  %v98_v59 = vmul.u32 %v96_v50, %v72_v46  ;;  %v101_v63 = vmul.u32 %v97_v51, %v73_v47 }
  0x8f   :  { %v77_v52 = vmul.u32 %v75_v49, %v72_v46  ;;  %v78_v53 = vmul.u32 %v74_v48, %v73_v47  ;;  %v76_v56 = vmul.u32 %v74_v48, %v72_v46  ;;  %v79_v58 = vmul.u32 %v75_v49, %v73_v47 }
  0x90   :  { %v102_v60 = vshll.u32 %v99_v54, 16  ;;  %v104_v2 = vshll.u32 %v100_v55, 16  ;;  %v103_v18 = vshrl.u32 %v99_v54, 16  ;;  %v105_v24 = vshrl.u32 %v100_v55, 16 }
  0x91   :  { %v80_v57 = vshll.u32 %v77_v52, 16  ;;  %v82_v61 = vshll.u32 %v78_v53, 16  ;;  %v81_v12 = vshrl.u32 %v77_v52, 16  ;;  %v83_v22 = vshrl.u32 %v78_v53, 16 }
  0x92   :  { %vm106_vm6 = vc.u32 %v98_v59, %v102_v60  ;;  %v108_v3 = vadd.s32 %v102_v60, %v98_v59 }
  0x93   :  { %vm84_vm5 = vc.u32 %v76_v56, %v80_v57  ;;  %v86_v62 = vadd.s32 %v80_v57, %v76_v56  ;;  %v107_v6 = vsel %vm106_vm6, 1, %v392_v1 }
  0x94   :  { %v85_v0 = vsel %vm84_vm5, 1, %v392_v1  ;;  %v109_v10 = vadd.s32 %v107_v6, %v101_v63  ;;  %vm110_vm8 = vc.u32 %v108_v3, %v104_v2  ;;  %v112_v27 = vadd.s32 %v108_v3, %v104_v2 }
  0x95   :  { %v87_v5 = vadd.s32 %v85_v0, %v79_v58  ;;  %vm88_vm7 = vc.u32 %v86_v62, %v82_v61  ;;  %v111_v17 = vsel %vm110_vm8, 1, %v392_v1 }
  0x96   :  { %v89_v9 = vsel %vm88_vm7, 1, %v392_v1  ;;  %v113_v19 = vadd.s32 %v111_v17, %v109_v10 }
  0x97   :  { %v91_v14 = vadd.s32 %v89_v9, %v87_v5 }
  0x98   :  { %v114_v25 = vadd.s32 %v113_v19, %v103_v18 }
  0x99   :  { %v92_v23 = vadd.s32 %v91_v14, %v81_v12 }
  0x9a   :  { %v115_v16 = vadd.s32 %v114_v25, %v105_v24 }
  0x9b   :  { %v93_v26 = vadd.s32 %v92_v23, %v83_v22 }
  0x9c   :  { %v119_v1 = vadd.s32 1, %v115_v16 }
  0x9d   :  { %vm118_vm9 = vc.u32 %v93_v26, %v112_v27  ;;  %v117_v15 = vadd.s32 %v112_v27, %v93_v26 }
  0x9e   :  { %v120_v29 = vsel %vm118_vm9, %v119_v1, %v115_v16 }
  0x9f   :  { %v121_v30 = vadd.s32 %v120_v29, %v116_v28 }
  0xa1   :  { %v122_v31 = vadd.s32 536870912, %v121_v30 }
  0xa3   :  { %v123_v32 = vshrl.u32 %v122_v31, 30 }
  0xa5   :  { %v124_v34 = vshll.u32 %v123_v32, 30  ;;  %v147_v53 = vsub.s32 4, %v123_v32 }
  0xa7   :  { %v125_v33 = vsub.s32 %v121_v30, %v124_v34  ;;  %v148_v58 = vsel %vm25_vm12, %v147_v53, %v123_v32 }
  0xa8   :  { %v150_v61 = vsel %vm24_vm13, 0, %v148_v58 }
  0xa9   :  { %vm126_vm10 = vcmp.lt.s32.totalorder %v125_v33, 0  ;;  %v127_v35 = vsub.s32 0, %v125_v33  ;;  %v167_v3 = vadd.s32 3, %v150_v61  ;;  %v323_v9 = vand.u32 3, %v150_v61 }
  0xab   :  { %v128_v36 = vsel %vm126_vm10, %v127_v35, %v125_v33  ;;  %v168_v10 = vand.u32 3, %v167_v3  ;;  %vm324_vm14 = vcmp.lt.s32.totalorder %v323_v9, 2  ;;  %vm325_vm15 = vcmp.eq.s32.totalorder %v323_v9, 0 }
  0xac   :  { %v129_v38 = vclz %v128_v36  ;;  %vm328_vm3 = vcmp.eq.s32.totalorder %v323_v9, 2 }
  0xad   :  { %vm169_vm0 = vcmp.lt.s32.totalorder %v168_v10, 2  ;;  %vm170_vm1 = vcmp.eq.s32.totalorder %v168_v10, 0  ;;  %vm173_vm2 = vcmp.eq.s32.totalorder %v168_v10, 2 }
  0xae   :  { %v351_v39 = vadd.s32 4294967294, %v129_v38 }
  0xb0   :  { %vm352_vm11 = vcmp.lt.s32.totalorder %v351_v39, 0 }
  0xb1   :  { %v132_v40 = vsel %vm352_vm11, 0, %v351_v39 }
  0xb2   :  { %v133_v41 = vsub.s32 32, %v132_v40  ;;  %v137_v42 = vsub.s32 4294967266, %v132_v40  ;;  %v134_v43 = vshll.u32 %v125_v33, %v132_v40 }
  0xb4   :  { %v135_v44 = vshrl.u32 %v117_v15, %v133_v41  ;;  %v138_v45 = vadd.s32 127, %v137_v42 }
  0xb6   :  { %v136_v37 = vor.u32 %v135_v44, %v134_v43  ;;  %v139_v46 = vshll.u32 %v138_v45, 23 }
  0xb8   :  { %v140_v47 = vor.u32 4788187, %v139_v46  ;;  %v143_v49 = vcvt.s32.f32 %v136_v37 }
  0xba   :  { %v141_v48 = vand.u32 2147483647, %v140_v47 }
  0xbc   :  { %v144_v50 = vmul.f32 %v143_v49, %v141_v48 }
  0xbe   :  { %v145_v51 = vxor.u32 2147483648, %v144_v50 }
  0xc0   :  { %v146_v52 = vsel %vm25_vm12, %v145_v51, %v144_v50 }
  0xc1   :  { %v149_v54 = vsel %vm24_vm13, %v422_v4, %v146_v52 }
  0xc2   :  { %v151_v55 = vmul.f32 %v149_v54, %v149_v54 }
  0xc4   :  { %v152_v56 = vmul.f32 -0.001358992, %v151_v55  ;;  %v159_v57 = vmul.f32 -0.00019511016, %v151_v55 }
  0xc6   :  { %v153_v59 = vadd.f32 0.041655596, %v152_v56  ;;  %v160_v60 = vadd.f32 0.008332121, %v159_v57 }
  0xc8   :  { %v154_v62 = vmul.f32 %v153_v59, %v151_v55  ;;  %v161_v63 = vmul.f32 %v160_v60, %v151_v55 }
  0xca   :  { %v155_v0 = vadd.f32 -0.4999988, %v154_v62  ;;  %v162_v2 = vadd.f32 -0.16666654, %v161_v63 }
  0xcc   :  { %v156_v5 = vmul.f32 %v155_v0, %v151_v55  ;;  %v163_v6 = vmul.f32 %v162_v2, %v151_v55 }
  0xce   :  { %v157_v7 = vadd.f32 1.0, %v156_v5  ;;  %v164_v8 = vadd.f32 1.0, %v163_v6 }
  0xd0   :  { %v165_v11 = vmul.f32 %v164_v8, %v149_v54  ;;  %v174_v12 = vxor.u32 2147483648, %v157_v7 }
  0xd2   :  { %v171_v14 = vxor.u32 2147483648, %v165_v11  ;;  %v175_v18 = vsel %vm173_vm2, %v174_v12, %v165_v11  ;;  %v330_v20 = vsel %vm328_vm3, %v174_v12, %v165_v11 }
  0xd4   :  { %v172_v17 = vsel %vm170_vm1, %v157_v7, %v171_v14  ;;  %v327_v19 = vsel %vm325_vm15, %v157_v7, %v171_v14 }
  0xd5   :  { %v176_v21 = vsel %vm169_vm0, %v172_v17, %v175_v18  ;;  %v331_v22 = vsel %vm324_vm14, %v327_v19, %v330_v20 }
  0xd6   :  { %v177_v23 = vsel %vm166_vm4, nan, %v176_v21  ;;  %v332_v24 = vsel %vm166_vm4, nan, %v331_v22 }
  0xd7   :  { %178 = vst [vmem:[#allocation2] sm:$0xff] %v177_v23 }
  0xd8   :  { %333 = vst [vmem:[#allocation2 + $0x8] sm:$0xff] %v332_v24 }
  0xd9   :  { %344 = dma.vmem_to_hbm [thread:$0]  %s340_s1, 256, %s342_s15, [#allocation3]  }
  0xda   :  { %390 = dma.done.wait [#allocation3], 256  }
  0xdb   :  { %391 = vsyncadd [#allocation3], 4294967040 }
  0xdc   :  { %349 = vsyncpa [#allocation3], 1 }

</bundles_post_ra>
